<compile_context>
chip_gen: v7x
topology: tpu7x:2x2x1
jax: 0.10.0
libtpu: 0.0.40
codegen_flags: <defaults>
</compile_context>

<pallas_src>
import functools

import jax
import jax.numpy as jnp
from jax.experimental import pallas as pl
from jax.experimental.pallas import tpu as pltpu

HIDDEN_DIM = 64  # fixed by the module spec: nn.Linear(state_dim, 64)


def encoder_kernel(x_ref, w1_ref, b1_ref, w2_ref, b2_ref, o_ref, *, mxu_dtype):
    # x_ref : (TB, state_dim)          b1_ref: (1, 64)
    # w1_ref: (state_dim, 64)          w2_ref: (64, latent_dim)
    # b2_ref: (1, latent_dim)          o_ref : (TB, latent_dim)
    x = x_ref[...].astype(mxu_dtype)        # bf16 operands feed the MXU fast path
    w1 = w1_ref[...].astype(mxu_dtype)
    w2 = w2_ref[...].astype(mxu_dtype)
    b1 = b1_ref[...].astype(jnp.float32)    # bias/ReLU stay in f32 (safe on v5e VPU)
    b2 = b2_ref[...].astype(jnp.float32)

    h = jnp.dot(x, w1, preferred_element_type=jnp.float32) + b1     # MXU, f32 acc
    h = jnp.maximum(h, 0.0)                                         # ReLU on VPU
    z = jnp.dot(h.astype(mxu_dtype), w2,
                preferred_element_type=jnp.float32) + b2            # MXU, f32 acc
    o_ref[...] = z.astype(o_ref.dtype)


def _round_up(n, m):
    return ((n + m - 1) // m) * m


def feature_encoder_forward(x, w1, b1, w2, b2, *, block_b=4096,
                            mxu_dtype=jnp.bfloat16):
    """x: (B, state_dim) -> (B, latent_dim). Single fused Pallas kernel.

    block_b is a tunable per-generation knob; 4096 keeps the padded VMEM
    footprint (~3 KB per batch row with 128-lane padding and double buffering)
    around 12-13 MiB, safe on every generation with the explicit 40 MiB limit.
    Pass mxu_dtype=jnp.float32 for bit-exact f32 matmuls if needed.
    """
    B, in_dim = x.shape
    H = w1.shape[1]
    L = w2.shape[1]
    b1_2d = b1.reshape(1, H)
    b2_2d = b2.reshape(1, L)

    # Batch tile selection:
    #  * small B -> one whole-resident block (single grid step, minimal overhead)
    #  * large B -> big tiles (multiple of 8), but capped so the grid has >= 2
    #    steps; otherwise dimension_semantics=("parallel",) cannot shard the
    #    batch across v7x's two TensorCores and one core sits idle.
    small_b = min(block_b, 1024)
    if B <= small_b:
        tb = B
    else:
        tb = min(block_b, _round_up(pl.cdiv(B, 2), 8))
    grid = (pl.cdiv(B, tb),)

    kernel = functools.partial(encoder_kernel, mxu_dtype=mxu_dtype)

    return pl.pallas_call(
        kernel,
        out_shape=jax.ShapeDtypeStruct((B, L), jnp.float32),
        grid_spec=pltpu.PrefetchScalarGridSpec(
            num_scalar_prefetch=0,
            grid=grid,
            in_specs=[
                pl.BlockSpec((tb, in_dim), lambda i: (i, 0)),  # x: tiled over batch
                pl.BlockSpec((in_dim, H), lambda i: (0, 0)),   # w1: resident
                pl.BlockSpec((1, H), lambda i: (0, 0)),        # b1: resident
                pl.BlockSpec((H, L), lambda i: (0, 0)),        # w2: resident
                pl.BlockSpec((1, L), lambda i: (0, 0)),        # b2: resident
            ],
            out_specs=pl.BlockSpec((tb, L), lambda i: (i, 0)),
        ),
        compiler_params=pltpu.CompilerParams(
            dimension_semantics=("parallel",),     # batch axis shards over TCs
            vmem_limit_bytes=40 * 1024 * 1024,     # headroom above v5e's 16 MiB default
        ),
    )(x, w1, b1_2d, w2, b2_2d)


def init_feature_encoder_params(key, state_dim, latent_dim, hidden_dim=HIDDEN_DIM):
    """Mirror torch.nn.Linear default init: U[-1/sqrt(fan_in), 1/sqrt(fan_in)]."""
    k1, k2, k3, k4 = jax.random.split(key, 4)
    bound1 = 1.0 / jnp.sqrt(state_dim)
    bound2 = 1.0 / jnp.sqrt(hidden_dim)
    w1 = jax.random.uniform(k1, (state_dim, hidden_dim), jnp.float32, -bound1, bound1)
    b1 = jax.random.uniform(k2, (hidden_dim,), jnp.float32, -bound1, bound1)
    w2 = jax.random.uniform(k3, (hidden_dim, latent_dim), jnp.float32, -bound2, bound2)
    b2 = jax.random.uniform(k4, (latent_dim,), jnp.float32, -bound2, bound2)
    return w1, b1, w2, b2


if __name__ == "__main__":
    state_dim, latent_dim = 12, 16

    key = jax.random.PRNGKey(0)
    kp, kx1, kx2 = jax.random.split(key, 3)
    w1, b1, w2, b2 = init_feature_encoder_params(kp, state_dim, latent_dim)

    def ref_fwd(x, dt):
        # Pure-JAX reference with matmul operands in dtype `dt`, f32 elsewhere.
        h = jnp.dot(x.astype(dt), w1.astype(dt),
                    preferred_element_type=jnp.float32) + b1
        h = jnp.maximum(h, 0.0)
        return jnp.dot(h.astype(dt), w2.astype(dt),
                       preferred_element_type=jnp.float32) + b2

    # Small batch: whole-resident single-grid-step path.
    x_small = jax.random.normal(kx1, (8, state_dim), jnp.float32)
    out_small = jax.block_until_ready(
        feature_encoder_forward(x_small, w1, b1, w2, b2))
    assert out_small.shape == (8, latent_dim)
    # Matches the bf16-operand reference tightly, and the f32 PyTorch-equivalent
    # math within bf16 rounding error.
    assert jnp.allclose(out_small, ref_fwd(x_small, jnp.bfloat16), atol=2e-3, rtol=2e-3)
    assert jnp.allclose(out_small, ref_fwd(x_small, jnp.float32), atol=5e-2, rtol=5e-2)

    # Larger batch: exercises the multi-step tiled path (>=2 grid steps) and a
    # partial final block (2063 is not a multiple of the 1032-row tile).
    x_big = jax.random.normal(kx2, (2063, state_dim), jnp.float32)
    out_big = jax.block_until_ready(
        feature_encoder_forward(x_big, w1, b1, w2, b2))
    assert out_big.shape == (2063, latent_dim)
    assert jnp.allclose(out_big, ref_fwd(x_big, jnp.bfloat16), atol=2e-3, rtol=2e-3)
    assert jnp.allclose(out_big, ref_fwd(x_big, jnp.float32), atol=5e-2, rtol=5e-2)

    print("KERNEL_OK")
</pallas_src>

<mosaic_0001>
module attributes {stable_mosaic.version = 11 : i64} {
  func.func @encoder_kernel(%arg0: i32, %arg1: memref<8x12xf32, #tpu.memory_space<vmem>>, %arg2: memref<12x64xf32, #tpu.memory_space<vmem>>, %arg3: memref<1x64xf32, #tpu.memory_space<vmem>>, %arg4: memref<64x16xf32, #tpu.memory_space<vmem>>, %arg5: memref<1x16xf32, #tpu.memory_space<vmem>>, %arg6: memref<8x16xf32, #tpu.memory_space<vmem>>) attributes {dimension_semantics = [#tpu.dimension_semantics<parallel>], iteration_bounds = array<i64: 1>, scalar_prefetch = 0 : i64, scratch_operands = 0 : i64, tpu.core_type = #tpu.core_type<tc>, window_params = [{transform_indices = @transform_0, window_bounds = array<i64: 8, 12>}, {pipeline_mode = #tpu.pipeline_mode<synchronous>, transform_indices = @transform_1, window_bounds = array<i64: 12, 64>}, {pipeline_mode = #tpu.pipeline_mode<synchronous>, transform_indices = @transform_2, window_bounds = array<i64: 1, 64>}, {pipeline_mode = #tpu.pipeline_mode<synchronous>, transform_indices = @transform_3, window_bounds = array<i64: 64, 16>}, {pipeline_mode = #tpu.pipeline_mode<synchronous>, transform_indices = @transform_4, window_bounds = array<i64: 1, 16>}, {transform_indices = @transform_5, window_bounds = array<i64: 8, 16>}]} {
    %c0 = arith.constant 0 : index
    %c0_0 = arith.constant 0 : index
    %0 = vector.load %arg1[%c0, %c0_0] : memref<8x12xf32, #tpu.memory_space<vmem>>, vector<8x12xf32>
    %1 = arith.truncf %0 : vector<8x12xf32> to vector<8x12xbf16>
    %c0_1 = arith.constant 0 : index
    %c0_2 = arith.constant 0 : index
    %2 = vector.load %arg2[%c0_1, %c0_2] : memref<12x64xf32, #tpu.memory_space<vmem>>, vector<12x64xf32>
    %3 = arith.truncf %2 : vector<12x64xf32> to vector<12x64xbf16>
    %c0_3 = arith.constant 0 : index
    %c0_4 = arith.constant 0 : index
    %4 = vector.load %arg4[%c0_3, %c0_4] : memref<64x16xf32, #tpu.memory_space<vmem>>, vector<64x16xf32>
    %5 = arith.truncf %4 : vector<64x16xf32> to vector<64x16xbf16>
    %c0_5 = arith.constant 0 : index
    %c0_6 = arith.constant 0 : index
    %6 = vector.load %arg3[%c0_5, %c0_6] : memref<1x64xf32, #tpu.memory_space<vmem>>, vector<1x64xf32>
    %c0_7 = arith.constant 0 : index
    %c0_8 = arith.constant 0 : index
    %7 = vector.load %arg5[%c0_7, %c0_8] : memref<1x16xf32, #tpu.memory_space<vmem>>, vector<1x16xf32>
    %cst = arith.constant dense<0.000000e+00> : vector<8x64xf32>
    %8 = tpu.matmul %1, %3, %cst {dimension_numbers = #tpu.dot_dimension_numbers<[1], [0], [0], [1], [0, 0, 1, 1], [], []>} : vector<8x12xbf16>, vector<12x64xbf16>, vector<8x64xf32> -> vector<8x64xf32>
    %9 = vector.broadcast %6 : vector<1x64xf32> to vector<8x64xf32>
    %10 = arith.addf %8, %9 : vector<8x64xf32>
    %cst_9 = arith.constant 0.000000e+00 : f32
    %11 = vector.broadcast %cst_9 : f32 to vector<8x64xf32>
    %12 = arith.maximumf %10, %11 : vector<8x64xf32>
    %13 = arith.truncf %12 : vector<8x64xf32> to vector<8x64xbf16>
    %cst_10 = arith.constant dense<0.000000e+00> : vector<8x16xf32>
    %14 = tpu.matmul %13, %5, %cst_10 {dimension_numbers = #tpu.dot_dimension_numbers<[1], [0], [0], [1], [0, 0, 1, 1], [], []>} : vector<8x64xbf16>, vector<64x16xbf16>, vector<8x16xf32> -> vector<8x16xf32>
    %15 = vector.broadcast %7 : vector<1x16xf32> to vector<8x16xf32>
    %16 = arith.addf %14, %15 : vector<8x16xf32>
    %c0_11 = arith.constant 0 : index
    %c0_12 = arith.constant 0 : index
    %17 = vector.load %arg6[%c0_11, %c0_12] : memref<8x16xf32, #tpu.memory_space<vmem>>, vector<8x16xf32>
    tpu.vector_store %arg6[%c0_11, %c0_12], %16 {strides = array<i32>} : memref<8x16xf32, #tpu.memory_space<vmem>>, vector<8x16xf32>,
    return
  }
  func.func @transform_0(%arg0: i32) -> (i32, i32) {
    %c0_i32 = arith.constant 0 : i32
    %c0_i32_0 = arith.constant 0 : i32
    return %arg0, %c0_i32 : i32, i32
  }
  func.func @transform_1(%arg0: i32) -> (i32, i32) {
    %c0_i32 = arith.constant 0 : i32
    %c0_i32_0 = arith.constant 0 : i32
    %c0_i32_1 = arith.constant 0 : i32
    return %c0_i32, %c0_i32_0 : i32, i32
  }
  func.func @transform_2(%arg0: i32) -> (i32, i32) {
    %c0_i32 = arith.constant 0 : i32
    %c0_i32_0 = arith.constant 0 : i32
    %c0_i32_1 = arith.constant 0 : i32
    return %c0_i32, %c0_i32_0 : i32, i32
  }
  func.func @transform_3(%arg0: i32) -> (i32, i32) {
    %c0_i32 = arith.constant 0 : i32
    %c0_i32_0 = arith.constant 0 : i32
    %c0_i32_1 = arith.constant 0 : i32
    return %c0_i32, %c0_i32_0 : i32, i32
  }
  func.func @transform_4(%arg0: i32) -> (i32, i32) {
    %c0_i32 = arith.constant 0 : i32
    %c0_i32_0 = arith.constant 0 : i32
    %c0_i32_1 = arith.constant 0 : i32
    return %c0_i32, %c0_i32_0 : i32, i32
  }
  func.func @transform_5(%arg0: i32) -> (i32, i32) {
    %c0_i32 = arith.constant 0 : i32
    %c0_i32_0 = arith.constant 0 : i32
    return %arg0, %c0_i32 : i32, i32
  }
}

</mosaic_0001>

<bundles_post_ra>
// kernel: tpu_custom_call.1
= control target key start
LH: loop header
LB: loop body
LE: loop exit
PB: predicated region body
PF: predicated region fallthrough
CT: control target
= control target key end

     0   :  { %vm51_vm0 = vcmask 1045504   ;;  %v219_v2 = vmov 0.0   ;;  %vm220_vm1 = vmmov 0   ;;  %s303_s0 = inlined_call_operand.vmem [shape: f32[8,12], index: 0, kind: input, shape index: {}]   ;;  %s304_s1 = inlined_call_operand.vmem [shape: f32[12,64], index: 1, kind: input, shape index: {}]   ;;  %s305_s2 = inlined_call_operand.vmem [shape: f32[1,64], index: 2, kind: input, shape index: {}]   ;;  %s306_s3 = inlined_call_operand.vmem [shape: f32[64,16], index: 3, kind: input, shape index: {}]   ;;  %s307_s4 = inlined_call_operand.vmem [shape: f32[1,16], index: 4, kind: input, shape index: {}]   ;;  %s308_s5 = inlined_call_operand.hbm [shape: f32[8,16], index: 5, kind: output, shape index: {}]  }
   0x1   :  { %v24_v0 = vld [vmem:[%s304_s1] sm:$0xff]  ;;  %v25_v1 = vld [vmem:[%s304_s1 + $0x8] sm:$0xf]  ;;  %174 = vmatprep.subr.bf16.mxu0 %v219_v2  ;;  %176 = vmatprep.mubr.msk.bf16.mxu0 %vm220_vm1, %v219_v2  ;;  %v29_v8 = vld [vmem:[%s306_s3 + $0x10] sm:$0xff] }
   0x2   :  { %v26_v3 = vpack.c.bf16 %v25_v1, %v24_v0  ;;  %v22_v4 = vld [vmem:[%s303_s0] sm:$0xff]  ;;  %v28_v6 = vld [vmem:[%s306_s3 + $0x8] sm:$0xff]  ;;  %180 = vmatprep.subr.bf16.mxu1 %v219_v2  ;;  %v30_v9 = vld [vmem:[%s306_s3 + $0x18] sm:$0xff]  ;;  %188 = vmatprep.mubr.msk.bf16.mxu1 %vm220_vm1, %v219_v2 }
   0x3   :  { %v27_v5 = vld [vmem:[%s306_s3] sm:$0xff]  ;;  %v23_v11 = vpack.c.bf16 %v22_v4, %v22_v4 }
   0x4   :  { %v35_v7 = vpack.c.bf16 %v28_v6, %v27_v5  ;;  %v53_v10 = vsel %vm51_vm0, %v26_v3, 0 }
   0x5   :  { %10 = vsyncpa [#allocation3], 0  ;;  %175 = vmatpush3.bf16.msra.mxu0 %v53_v10  ;;  %vm47_vm2 = vcmask 97280   ;;  %v36_v12 = vpack.c.bf16 %v30_v9, %v29_v8  ;;  %v31_v13 = vld [vmem:[%s306_s3 + $0x20] sm:$0xff]  ;;  %v32_v14 = vld [vmem:[%s306_s3 + $0x28] sm:$0xff]  ;;  %vm103_vm3 = vcmask 523264  }
   0x6   :  { %181 = vmatpush3.bf16.msra.mxu1 %v35_v7  ;;  %v37_v15 = vpack.c.bf16 %v32_v14, %v31_v13  ;;  %v33_v16 = vld [vmem:[%s306_s3 + $0x30] sm:$0xff]  ;;  %v34_v17 = vld [vmem:[%s306_s3 + $0x38] sm:$0xff]  ;;  %v163_v19 = vld [vmem:[%s305_s2] ss:$0 sm:$0xff]  ;;  %s221_s3 = smov [#allocation2]   ;;  %vm147_vm4 = vcmask 130048  }
   0x7   :  { %182 = vmatprep.subr.bf16.mxu1 %v219_v2  ;;  %v38_v18 = vpack.c.bf16 %v34_v17, %v33_v16  ;;  %v165_v27 = vld [vmem:[%s307_s4] ss:$0 sm:$0xff]  ;;  %s155_s17 = sshll.u32 %s221_s3, 4  ;;  %s156_s17 = int_to_ptr.vmem [resolvable:$true] %s155_s17 }
   0x8   :  { %177 = vmatmul.mubr.msk.bf16.vlgmr.msra.gmra.mrb[0].mxu0 %vm47_vm2, %v23_v11  ;;  %s195_s2 = scalar_lea.vmem %s156_s17, 128  ;;  %p200_p1 = scmp.lt.s32.totalorder %s156_s17, %s156_s17 }
   0x9   :  { %p196_p0 = scmp.ne.s32.totalorder %s156_s17, %s195_s2  ;;  %p201_p2 = scmp.lt.s32.totalorder %s195_s2, %s195_s2 }
   0xa   :  { %183 = vmatpush3.bf16.msra.mxu1 %v36_v12 }
   0xb   :  { %184 = vmatprep.subr.bf16.mxu1 %v219_v2  ;;  %p202_p3 = por %p201_p2, %p200_p1 }
   0xd   :  { %p203_p4 = pnand %p202_p3, %p196_p0 }
   0xe   :  { %185 = vmatpush3.bf16.msra.mxu1 %v37_v15 }
   0xf   :  { %186 = vmatprep.subr.bf16.mxu1 %v219_v2 }
  0x12   :  { %187 = vmatpush3.bf16.msra.mxu1 %v38_v18 }
  0xdb   :  { %v89_v20 = vpop.f32.mrb[0].mxu0 }
  0xdc   :  { %v90_v21 = vadd.f32 %v163_v19, %v89_v20  ;;  %v178_v22 = vpop.f32.mrb[1].mxu0 }
  0xdd   :  { %v92_v23 = vpop.f32.mrb[2].mxu0 }
  0xde   :  { %v95_v24 = vmax.f32 %v90_v21, 0.0  ;;  %v179_v25 = vpop.f32.mrb[3].mxu0 }
  0xe0   :  { %v96_v26 = vpack.c.bf16 %v95_v24, %v95_v24 }
  0xe2   :  { %189 = vmatmul.mubr.msk.bf16.vlgmr.msra.gmra.mrb[0].mxu1 %vm103_vm3, %v96_v26 }
 0x1b5   :  { %v141_v28 = vpop.f32.mrb[0].mxu1 }
 0x1b6   :  { %v142_v29 = vadd.f32 %v165_v27, %v141_v28  ;;  %v190_v30 = vpop.f32.mrb[1].mxu1 }
 0x1b7   :  { %v144_v31 = vpop.f32.mrb[2].mxu1 }
 0x1b8   :  { %v191_v32 = vpop.f32.mrb[3].mxu1  ;;  %148 = vst.msk [vmem:[#allocation2] sm:$0xff] %vm147_vm4, %v142_v29 }
 0x1b9   :  { %206 = shalt.err (!%p203_p4)
}
 0x1ba   :  { %s207_s4 = scalar_lea.hbm %s308_s5, 128 }
 0x1bb   :  { %p208_p5 = scmp.ne.s32.totalorder %s308_s5, %s207_s4  ;;  %p211_p6 = scmp.lt.u32.totalorder %s207_s4, %s308_s5 }
 0x1bd   :  { %p213_p7 = pnand %p211_p6, %p208_p5 }
 0x1bf   :  { %216 = shalt.err (!%p213_p7)
}
 0x1c0   :  { %158 = dma.vmem_to_hbm [thread:$0]  %s156_s17, 128, %s308_s5, [#allocation3]  }
 0x1c1   :  { %217 = dma.done.wait [#allocation3], 128  }
 0x1c2   :  { %218 = vsyncadd [#allocation3], 4294967168 }
 0x1c3   :  { %162 = vsyncpa [#allocation3], 1 }

</bundles_post_ra>
